<compile_context>
chip_gen: v5e
topology: v5e:2x2
jax: 0.10.0
libtpu: 0.0.40
codegen_flags: <defaults>
</compile_context>

<pallas_src>
from functools import partial

import jax
import jax.numpy as jnp
from jax.experimental import pallas as pl
from jax.experimental.pallas import tpu as pltpu


def _round_up(x, m):
    return (x + m - 1) // m * m


def _nnlm_kernel(x_ref, convw_ref, convb_ref, projw_ref, projb_ref,
                 logits_ref, hid_ref, hid_bf16):
    """One (row_tile, vocab_tile) grid step.

    x_ref      : (tm, kW*H) bf16   im2col rows (kW shifted embeddings, concatenated)
    convw_ref  : (kW*H, H)  bf16   flattened Conv1d weight
    convb_ref  : (1, H)     f32
    projw_ref  : (H, tv)    bf16   tied embedding table (transposed), vocab tile
    projb_ref  : (1, tv)    f32
    logits_ref : (tm, tv)   f32    output tile
    hid_ref    : (tm, H)    f32    output (resident across the vocab axis)
    hid_bf16   : (tm, H)    bf16   VMEM scratch, reused across vocab tiles
    """
    # Causal conv: single MXU matmul with K = kW*H.  Only on the first vocab tile.
    @pl.when(pl.program_id(1) == 0)
    def _():
        hid = jnp.dot(x_ref[...], convw_ref[...],
                      preferred_element_type=jnp.float32) + convb_ref[...]
        hid_ref[...] = hid
        hid_bf16[...] = hid.astype(jnp.bfloat16)

    # Tied projection to this vocabulary tile (bf16 MXU, f32 accumulate).
    logits = jnp.dot(hid_bf16[...], projw_ref[...],
                     preferred_element_type=jnp.float32) + projb_ref[...]
    logits_ref[...] = logits.astype(logits_ref.dtype)


def nnlm_forward(tokens, params, kW=3):
    """tokens: (T, N) int32. Returns (logits (T,N,V) f32, hid (T,N,H) f32)."""
    lut_w = params["lut_w"]        # (V, H)
    conv_w = params["conv_w"]      # (H_out, H_in, kW)  -- torch Conv1d layout
    conv_b = params["conv_b"]      # (H,)
    proj_w = params["proj_w"]      # (V, H)  -- tied to lut_w
    proj_b = params["proj_b"]      # (V,)

    T, N = tokens.shape
    V, H = lut_w.shape
    R = T * N

    # --- glue (XLA): embedding gather + causal zero pad + im2col -----------------
    # TODO(synk): pull the gather/pad into the kernel via scalar-prefetched token
    # ids to avoid materializing the (T, N, kW*H) im2col slab in HBM.
    emb = lut_w[tokens]                                      # (T, N, H)
    pad = jnp.zeros((kW - 1, N, H), emb.dtype)
    emb_pad = jnp.concatenate([pad, emb], axis=0)            # (T+kW-1, N, H)
    # im2col: output position t gathers taps emb_pad[t], ..., emb_pad[t+kW-1]
    x = jnp.concatenate([emb_pad[k:k + T] for k in range(kW)], axis=-1)   # (T,N,kW*H)
    x = x.reshape(R, kW * H)

    # Conv1d: hid[t,n,o] = b[o] + sum_{i,k} w[o,i,k] * emb_pad[t+k,n,i]
    conv_w_flat = jnp.transpose(conv_w, (2, 1, 0)).reshape(kW * H, H)     # (kW*H, H)
    proj_w_t = proj_w.T                                                   # (H, V)

    # --- tiling -------------------------------------------------------------------
    tm = min(256, _round_up(R, 8))                 # row tile (MXU-friendly, VMEM safe)
    R_pad = _round_up(R, tm)
    V_pad = _round_up(V, 128)
    tv = next(t for t in (512, 256, 128) if V_pad % t == 0)   # lane-dense vocab tile
    grid = (R_pad // tm, V_pad // tv)

    x_p = jnp.pad(x, ((0, R_pad - R), (0, 0))).astype(jnp.bfloat16)
    conv_w_bf = conv_w_flat.astype(jnp.bfloat16)
    conv_b_2d = conv_b.reshape(1, H).astype(jnp.float32)
    proj_w_p = jnp.pad(proj_w_t, ((0, 0), (0, V_pad - V))).astype(jnp.bfloat16)
    proj_b_p = jnp.pad(proj_b, (0, V_pad - V)).reshape(1, V_pad).astype(jnp.float32)

    flops = 2 * R * (kW * H * H + H * V)
    bytes_accessed = (x_p.size * 2 + conv_w_bf.size * 2 + proj_w_p.size * 2
                      + R_pad * V_pad * 4 + R_pad * H * 4)

    logits_p, hid_p = pl.pallas_call(
        _nnlm_kernel,
        out_shape=(jax.ShapeDtypeStruct((R_pad, V_pad), jnp.float32),
                   jax.ShapeDtypeStruct((R_pad, H), jnp.float32)),
        grid_spec=pltpu.PrefetchScalarGridSpec(
            num_scalar_prefetch=0,
            grid=grid,
            in_specs=[
                pl.BlockSpec((tm, kW * H), lambda i, j: (i, 0)),   # im2col rows
                pl.BlockSpec((kW * H, H), lambda i, j: (0, 0)),    # conv weight
                pl.BlockSpec((1, H), lambda i, j: (0, 0)),         # conv bias
                pl.BlockSpec((H, tv), lambda i, j: (0, j)),        # proj weight tile
                pl.BlockSpec((1, tv), lambda i, j: (0, j)),        # proj bias tile
            ],
            out_specs=(
                pl.BlockSpec((tm, tv), lambda i, j: (i, j)),       # logits tile
                pl.BlockSpec((tm, H), lambda i, j: (i, 0)),        # hid (resident over j)
            ),
            scratch_shapes=[pltpu.VMEM((tm, H), jnp.bfloat16)],
        ),
        compiler_params=pltpu.CompilerParams(
            dimension_semantics=("parallel", "arbitrary"),
            vmem_limit_bytes=32 * 1024 * 1024),
        cost_estimate=pl.CostEstimate(flops=flops, transcendentals=0,
                                      bytes_accessed=bytes_accessed),
    )(x_p, conv_w_bf, conv_b_2d, proj_w_p, proj_b_p)

    logits = logits_p[:R, :V].reshape(T, N, V)
    hid = hid_p[:R, :].reshape(T, N, H)
    return logits, hid


def nnlm_forward_ref(tokens, params, kW=3):
    """Pure-JAX (f32) reference for correctness check."""
    lut_w, conv_w, conv_b = params["lut_w"], params["conv_w"], params["conv_b"]
    proj_w, proj_b = params["proj_w"], params["proj_b"]
    T, N = tokens.shape
    emb = lut_w[tokens]
    pad = jnp.zeros((kW - 1, N, emb.shape[-1]), emb.dtype)
    ep = jnp.concatenate([pad, emb], axis=0)
    hid = conv_b
    for k in range(kW):
        hid = hid + jnp.einsum('tni,oi->tno', ep[k:k + T], conv_w[:, :, k])
    logits = jnp.einsum('tnh,vh->tnv', hid, proj_w) + proj_b
    return logits, hid


if __name__ == "__main__":
    # Small shapes consistent with the module: seq T=8, batch N=2, nhid H=32,
    # vocab V=128, kW=3, nlayers=1 (mlp identity), tieweights=True.
    T, N, H, V, kW = 8, 2, 32, 128, 3

    key = jax.random.PRNGKey(0)
    k_lut, k_cw, k_cb, k_pb, k_tok = jax.random.split(key, 5)

    lut_w = 0.1 * jax.random.normal(k_lut, (V, H), jnp.float32)
    params = dict(
        lut_w=lut_w,
        conv_w=0.1 * jax.random.normal(k_cw, (H, H, kW), jnp.float32),
        conv_b=0.1 * jax.random.normal(k_cb, (H,), jnp.float32),
        proj_w=lut_w,                                        # tied weights
        proj_b=0.1 * jax.random.normal(k_pb, (V,), jnp.float32),
    )
    tokens = jax.random.randint(k_tok, (T, N), 0, V, jnp.int32)

    logits, hid = jax.jit(partial(nnlm_forward, kW=kW))(tokens, params)
    jax.block_until_ready((logits, hid))

    logits_ref, hid_ref = nnlm_forward_ref(tokens, params, kW=kW)
    assert logits.shape == (T, N, V) and hid.shape == (T, N, H)
    # bf16 matmul operands with f32 accumulation -> compare with bf16-level tolerance.
    assert jnp.allclose(hid, hid_ref, rtol=5e-2, atol=1e-2)
    assert jnp.allclose(logits, logits_ref, rtol=5e-2, atol=1e-2)

    print("KERNEL_OK")
</pallas_src>

<mosaic_0001>
module attributes {stable_mosaic.version = 11 : i64} {
  func.func @_nnlm_kernel(%arg0: i32, %arg1: i32, %arg2: memref<16x96xbf16, #tpu.memory_space<vmem>>, %arg3: memref<96x32xbf16, #tpu.memory_space<vmem>>, %arg4: memref<1x32xf32, #tpu.memory_space<vmem>>, %arg5: memref<32x128xbf16, #tpu.memory_space<vmem>>, %arg6: memref<1x128xf32, #tpu.memory_space<vmem>>, %arg7: memref<16x128xf32, #tpu.memory_space<vmem>>, %arg8: memref<16x32xf32, #tpu.memory_space<vmem>>, %arg9: memref<16x32xbf16, #tpu.memory_space<vmem>>) attributes {dimension_semantics = [#tpu.dimension_semantics<parallel>, #tpu.dimension_semantics<arbitrary>], iteration_bounds = array<i64: 1, 1>, scalar_prefetch = 0 : i64, scratch_operands = 1 : i64, tpu.core_type = #tpu.core_type<tc>, window_params = [{transform_indices = @transform_0, window_bounds = array<i64: 16, 96>}, {pipeline_mode = #tpu.pipeline_mode<synchronous>, transform_indices = @transform_1, window_bounds = array<i64: 96, 32>}, {pipeline_mode = #tpu.pipeline_mode<synchronous>, transform_indices = @transform_2, window_bounds = array<i64: 1, 32>}, {transform_indices = @transform_3, window_bounds = array<i64: 32, 128>}, {transform_indices = @transform_4, window_bounds = array<i64: 1, 128>}, {transform_indices = @transform_5, window_bounds = array<i64: 16, 128>}, {transform_indices = @transform_6, window_bounds = array<i64: 16, 32>}]} {
    %c0_i32 = arith.constant 0 : i32
    %0 = arith.cmpi eq, %arg1, %c0_i32 : i32
    %1 = arith.extui %0 : i1 to i32
    %c0_i32_0 = arith.constant 0 : i32
    %2 = arith.cmpi ne, %1, %c0_i32_0 : i32
    scf.if %2 {
      %c0_8 = arith.constant 0 : index
      %c0_9 = arith.constant 0 : index
      %10 = vector.load %arg2[%c0_8, %c0_9] : memref<16x96xbf16, #tpu.memory_space<vmem>>, vector<16x96xbf16>
      %c0_10 = arith.constant 0 : index
      %c0_11 = arith.constant 0 : index
      %11 = vector.load %arg3[%c0_10, %c0_11] : memref<96x32xbf16, #tpu.memory_space<vmem>>, vector<96x32xbf16>
      %cst_12 = arith.constant dense<0.000000e+00> : vector<16x32xf32>
      %12 = tpu.matmul %10, %11, %cst_12 {dimension_numbers = #tpu.dot_dimension_numbers<[1], [0], [0], [1], [0, 0, 1, 1], [], []>} : vector<16x96xbf16>, vector<96x32xbf16>, vector<16x32xf32> -> vector<16x32xf32>
      %c0_13 = arith.constant 0 : index
      %c0_14 = arith.constant 0 : index
      %13 = vector.load %arg4[%c0_13, %c0_14] : memref<1x32xf32, #tpu.memory_space<vmem>>, vector<1x32xf32>
      %14 = vector.broadcast %13 : vector<1x32xf32> to vector<16x32xf32>
      %15 = arith.addf %12, %14 : vector<16x32xf32>
      %c0_15 = arith.constant 0 : index
      %c0_16 = arith.constant 0 : index
      %16 = vector.load %arg8[%c0_15, %c0_16] : memref<16x32xf32, #tpu.memory_space<vmem>>, vector<16x32xf32>
      tpu.vector_store %arg8[%c0_15, %c0_16], %15 {strides = array<i32>} : memref<16x32xf32, #tpu.memory_space<vmem>>, vector<16x32xf32>,
      %17 = arith.truncf %15 : vector<16x32xf32> to vector<16x32xbf16>
      %c0_17 = arith.constant 0 : index
      %c0_18 = arith.constant 0 : index
      %18 = vector.load %arg9[%c0_17, %c0_18] : memref<16x32xbf16, #tpu.memory_space<vmem>>, vector<16x32xbf16>
      tpu.vector_store %arg9[%c0_17, %c0_18], %17 {strides = array<i32>} : memref<16x32xbf16, #tpu.memory_space<vmem>>, vector<16x32xbf16>,
    } else {
    }
    %c0 = arith.constant 0 : index
    %c0_1 = arith.constant 0 : index
    %3 = vector.load %arg9[%c0, %c0_1] : memref<16x32xbf16, #tpu.memory_space<vmem>>, vector<16x32xbf16>
    %c0_2 = arith.constant 0 : index
    %c0_3 = arith.constant 0 : index
    %4 = vector.load %arg5[%c0_2, %c0_3] : memref<32x128xbf16, #tpu.memory_space<vmem>>, vector<32x128xbf16>
    %cst = arith.constant dense<0.000000e+00> : vector<16x128xf32>
    %5 = tpu.matmul %3, %4, %cst {dimension_numbers = #tpu.dot_dimension_numbers<[1], [0], [0], [1], [0, 0, 1, 1], [], []>} : vector<16x32xbf16>, vector<32x128xbf16>, vector<16x128xf32> -> vector<16x128xf32>
    %c0_4 = arith.constant 0 : index
    %c0_5 = arith.constant 0 : index
    %6 = vector.load %arg6[%c0_4, %c0_5] : memref<1x128xf32, #tpu.memory_space<vmem>>, vector<1x128xf32>
    %7 = vector.broadcast %6 : vector<1x128xf32> to vector<16x128xf32>
    %8 = arith.addf %5, %7 : vector<16x128xf32>
    %c0_6 = arith.constant 0 : index
    %c0_7 = arith.constant 0 : index
    %9 = vector.load %arg7[%c0_6, %c0_7] : memref<16x128xf32, #tpu.memory_space<vmem>>, vector<16x128xf32>
    tpu.vector_store %arg7[%c0_6, %c0_7], %8 {strides = array<i32>} : memref<16x128xf32, #tpu.memory_space<vmem>>, vector<16x128xf32>,
    return
  }
  func.func @transform_0(%arg0: i32, %arg1: i32) -> (i32, i32) {
    %c0_i32 = arith.constant 0 : i32
    %c0_i32_0 = arith.constant 0 : i32
    return %arg0, %c0_i32 : i32, i32
  }
  func.func @transform_1(%arg0: i32, %arg1: i32) -> (i32, i32) {
    %c0_i32 = arith.constant 0 : i32
    %c0_i32_0 = arith.constant 0 : i32
    %c0_i32_1 = arith.constant 0 : i32
    return %c0_i32, %c0_i32_0 : i32, i32
  }
  func.func @transform_2(%arg0: i32, %arg1: i32) -> (i32, i32) {
    %c0_i32 = arith.constant 0 : i32
    %c0_i32_0 = arith.constant 0 : i32
    %c0_i32_1 = arith.constant 0 : i32
    return %c0_i32, %c0_i32_0 : i32, i32
  }
  func.func @transform_3(%arg0: i32, %arg1: i32) -> (i32, i32) {
    %c0_i32 = arith.constant 0 : i32
    %c0_i32_0 = arith.constant 0 : i32
    return %c0_i32, %arg1 : i32, i32
  }
  func.func @transform_4(%arg0: i32, %arg1: i32) -> (i32, i32) {
    %c0_i32 = arith.constant 0 : i32
    %c0_i32_0 = arith.constant 0 : i32
    return %c0_i32, %arg1 : i32, i32
  }
  func.func @transform_5(%arg0: i32, %arg1: i32) -> (i32, i32) {
    %c0_i32 = arith.constant 0 : i32
    return %arg0, %arg1 : i32, i32
  }
  func.func @transform_6(%arg0: i32, %arg1: i32) -> (i32, i32) {
    %c0_i32 = arith.constant 0 : i32
    %c0_i32_0 = arith.constant 0 : i32
    return %arg0, %c0_i32 : i32, i32
  }
}

</mosaic_0001>

<bundles_post_ra>
// kernel: nnlm_forward.1
= control target key start
LH: loop header
LB: loop body
LE: loop exit
PB: predicated region body
PF: predicated region fallthrough
CT: control target
= control target key end

     0   :  { %12 = vsyncpa [#allocation4], 0  ;;  %s385_s0 = inlined_call_operand.vmem [shape: bf16[16,96], index: 0, kind: input, shape index: {}]   ;;  %s386_s1 = inlined_call_operand.vmem [shape: bf16[96,32], index: 1, kind: input, shape index: {}]   ;;  %s387_s2 = inlined_call_operand.vmem [shape: f32[1,32], index: 2, kind: input, shape index: {}]   ;;  %s388_s3 = inlined_call_operand.vmem [shape: bf16[32,128], index: 3, kind: input, shape index: {}]   ;;  %s389_s4 = inlined_call_operand.vmem [shape: f32[1,128], index: 4, kind: input, shape index: {}]   ;;  %s390_s5 = inlined_call_operand.hbm [shape: f32[16,128], index: 5, kind: output, shape index: {0}]   ;;  %s391_s6 = inlined_call_operand.hbm [shape: f32[16,32], index: 6, kind: output, shape index: {1}]  }
   0x1   :  { %v245_v0 = vld [vmem:[%s386_s1 + $0x28] sm:$0xff]  ;;  %v244_v1 = vld [vmem:[%s386_s1 + $0x20] sm:$0xff] }
   0x2   :  { %94 = vmatpush.bf16.msra.mxu0 %v245_v0 }
   0x3   :  { %13 = vsyncpa [#allocation6], 0  ;;  %v243_v2 = vld [vmem:[%s386_s1 + $0x18] sm:$0xff]  ;;  %v242_v3 = vld [vmem:[%s386_s1 + $0x10] sm:$0xff]  ;;  %vm88_vm0 = vcmask 785408   ;;  %vm106_vm1 = vcmask 261120  }
   0x4   :  { %v241_v4 = vld [vmem:[%s386_s1 + $0x8] sm:$0xff]  ;;  %v240_v5 = vld [vmem:[%s386_s1] sm:$0xff]  ;;  %vm111_vm2 = vcmask 257024   ;;  %s308_s18 = smov 128   ;;  %s309_s19 = smov 8  }
   0x5   :  { %v239_v6 = vld [vmem:[%s385_s0] sm:$0xff]  ;;  %v248_v7 = vld [vmem:[%s388_s3 + $0x8] sm:$0xff]  ;;  %s307_s0 = smov [#allocation5]   ;;  %s310_s22 = smov [#allocation3]  }
   0x6   :  { %95 = vmatpush.bf16.msra.mxu0 %v244_v1  ;;  %151 = vmatpush.bf16.msra.mxu1 %v248_v7  ;;  %v247_v8 = vld [vmem:[%s388_s3] sm:$0xff]  ;;  %s178_s1 = sshll.u32 %s307_s0, 4  ;;  %s165_s23 = sshll.u32 %s310_s22, 4  ;;  %s179_s1 = int_to_ptr.vmem [resolvable:$true] %s178_s1  ;;  %s166_s23 = int_to_ptr.vmem [resolvable:$true] %s165_s23 }
   0x7   :  { %v253_v9 = vld [vmem:[%s387_s2] ss:$0 sm:$0xff]  ;;  %s180_s2 = sshll.u32 %s391_s6, 4  ;;  %s167_s26 = sshll.u32 %s390_s5, 4  ;;  %s181_s2 = int_to_ptr.hbm [resolvable:$true] %s180_s2  ;;  %s168_s26 = int_to_ptr.hbm [resolvable:$true] %s167_s26 }
   0x8   :  { %v254_v17 = vld [vmem:[%s389_s4] ss:$0 sm:$0xff] }
   0xa   :  { %96 = vmatpush.bf16.msra.mxu0 %v243_v2  ;;  %152 = vmatpush.bf16.msra.mxu1 %v247_v8 }
   0xe   :  { %97 = vmatpush.bf16.msra.mxu0 %v242_v3 }
  0x12   :  { %98 = vmatpush.bf16.msra.mxu0 %v241_v4 }
  0x16   :  { %99 = vmatpush.bf16.msra.mxu0 %v240_v5 }
  0x19   :  { %225 = vmatmul.msk.bf16.vlgmr.msra.gmra.mxu0 %vm88_vm0, %v239_v6 }
  0x96   :  { %v101_v10 = vpop.f32.mrf.mxu0 }
  0x97   :  { %v102_v11 = vadd.f32 %v253_v9, %v101_v10 }
  0x99   :  { %v109_v12 = vpack.c.bf16 %v102_v11, %v102_v11  ;;  %107 = vst.msk [vmem:[#allocation5] sm:$0xff] %vm106_vm1, %v102_v11 }
  0x9b   :  { %112 = vst.msk [vmem:[#allocation2] sm:$0xf] %vm111_vm2, %v109_v12 }
  0x9e   :  { %v103_v13 = vpop.f32.mrf.mxu0 }
  0x9f   :  { %v104_v14 = vadd.f32 %v253_v9, %v103_v13 }
  0xa1   :  { %v110_v15 = vpack.c.bf16 %v104_v14, %v104_v14  ;;  %108 = vst.msk [vmem:[#allocation5 + $0x8] sm:$0xff] %vm106_vm1, %v104_v14 }
  0xa2   :  { %186 = dma.vmem_to_hbm [thread:$0]  %s179_s1, 256, %s181_s2, [#allocation6], %s308_s18, %s308_s18, %s309_s19  }
  0xa3   :  { %113 = vst.msk [vmem:[#allocation2 + $0x4] sm:$0xf] %vm111_vm2, %v110_v15 }
  0xaa   :  { %v246_v16 = vld [vmem:[#allocation2] sm:$0xff] }
  0xab   :  { %238 = vmatmul.msk.bf16.vlgmr.msra.gmra.mxu1 %vm106_vm1, %v246_v16 }
 0x128   :  { %v154_v18 = vpop.f32.mrf.mxu1 }
 0x129   :  { %v155_v19 = vadd.f32 %v254_v17, %v154_v18 }
 0x12b   :  { %159 = vst [vmem:[#allocation3] sm:$0xff] %v155_v19 }
 0x130   :  { %v156_v20 = vpop.f32.mrf.mxu1 }
 0x131   :  { %v157_v21 = vadd.f32 %v254_v17, %v156_v20 }
 0x133   :  { %160 = vst [vmem:[#allocation3 + $0x8] sm:$0xff] %v157_v21 }
 0x134   :  { %173 = dma.vmem_to_hbm [thread:$0]  %s166_s23, 256, %s168_s26, [#allocation4], %s308_s18, %s308_s18, %s309_s19  }
 0x135   :  { %303 = dma.done.wait [#allocation4], 256  }
 0x136   :  { %304 = vsyncadd [#allocation4], 4294967040 }
 0x137   :  { %305 = dma.done.wait [#allocation6], 256  }
 0x138   :  { %306 = vsyncadd [#allocation6], 4294967040 }
 0x139   :  { %195 = vsyncpa [#allocation4], 1 }
 0x13a   :  { %196 = vsyncpa [#allocation6], 1 }

</bundles_post_ra>
